<compile_context>
chip_gen: v7x
topology: tpu7x:2x2x1
jax: 0.10.0
libtpu: 0.0.40
codegen_flags: <defaults>
</compile_context>

<pallas_src>
import functools

import jax
import jax.numpy as jnp
from jax.experimental import pallas as pl
from jax.experimental.pallas import tpu as pltpu


# ---------------- kernel (single body; jnp broadcasting covers both param layouts) ----------

def _dytanh_kernel(alpha_ref, x_ref, w_ref, b_ref, o_ref, *, compute_dtype):
    # x/o: (br, tk).  w/b: either (1, tk) (row broadcast) or (br, 1) (lane broadcast).
    alpha = alpha_ref[0].astype(compute_dtype)
    x = x_ref[...].astype(compute_dtype)
    w = w_ref[...].astype(compute_dtype)
    b = b_ref[...].astype(compute_dtype)
    # jnp.tanh lowers to the EUP transcendental slot -> free filler under the HBM roofline.
    o_ref[...] = (jnp.tanh(alpha * x) * w + b).astype(o_ref.dtype)


# ---------------- chip-aware knobs ----------------

def _device_kind():
    try:
        return jax.devices()[0].device_kind.lower()
    except Exception:
        return ""


def _pick_tile_bytes(kind):
    # Per-step x-tile budget (the output tile is the same size; both are double-buffered).
    if ("v5 lite" in kind) or ("v5e" in kind) or ("v5lite" in kind):
        return 3 * 1024 * 1024          # ~93% of 0.82 TB/s roofline already
    if ("v6" in kind) or ("trillium" in kind):
        return 4 * 1024 * 1024          # ~93% of 1.4 TB/s roofline
    if "v7" in kind:
        return 6 * 1024 * 1024          # keeps per-step DMA >> 0.35 us grid overhead at 3.2 TB/s
    return 4 * 1024 * 1024


def _pick_compute_dtype(x_dtype, kind):
    # bf16-native VPU/EUP exists on v6e/v7x; keep f32 compute elsewhere (and for f32 inputs).
    if x_dtype == jnp.bfloat16 and (("v6" in kind) or ("v7" in kind) or ("trillium" in kind)):
        return jnp.bfloat16
    return jnp.float32


# ---------------- 2-D launcher ----------------

def _launch_2d(x2, w2, b2, alpha, *, row_bcast_params, tile_bytes, sub_mult, compute_dtype):
    dtype = x2.dtype
    itemsize = jnp.dtype(dtype).itemsize
    R, K = int(x2.shape[0]), int(x2.shape[1])

    # Lane block: full K if it fits the budget with the minimal row count, else the largest
    # 128-multiple that does (no arbitrary cap -> long contiguous HBM DMA rows, few grid steps).
    max_lanes = max(128, tile_bytes // max(1, sub_mult * itemsize))
    if K <= max_lanes:
        tk = K
    else:
        tk = max(128, (max_lanes // 128) * 128)

    # Row block: fill the byte budget.
    budget_rows = max(1, tile_bytes // max(1, tk * itemsize))
    if budget_rows >= R:
        br = R                                            # full dim is always legal
    else:
        br = max(sub_mult, (budget_rows // sub_mult) * sub_mult)

    # Megacore (v7x has 2 TCs): if a non-tiny array would fit in a single block, split the row
    # axis so both cores get a "parallel" block.
    total_bytes = R * K * itemsize
    if (pl.cdiv(R, br) * pl.cdiv(K, tk)) == 1 and total_bytes > (1 << 20) and R >= 2 * sub_mult:
        half = -(-R // 2)
        br = min(R, ((half + sub_mult - 1) // sub_mult) * sub_mult)

    block_bytes = br * tk * itemsize
    # x + out, each double-buffered, plus params / internal scratch headroom.
    vmem_limit = int(min(60 * 1024 * 1024, 4 * block_bytes + 8 * 1024 * 1024))

    grid = (pl.cdiv(R, br), pl.cdiv(K, tk))

    if row_bcast_params:
        w_spec = pl.BlockSpec((1, tk), lambda i, j: (0, j))      # broadcast over rows
    else:
        w_spec = pl.BlockSpec((br, 1), lambda i, j: (i, 0))      # broadcast over lanes

    kernel = functools.partial(_dytanh_kernel, compute_dtype=compute_dtype)

    return pl.pallas_call(
        kernel,
        out_shape=jax.ShapeDtypeStruct((R, K), dtype),
        grid_spec=pltpu.PrefetchScalarGridSpec(
            num_scalar_prefetch=0,
            grid=grid,
            in_specs=[
                pl.BlockSpec(memory_space=pltpu.MemorySpace.SMEM),   # alpha scalar
                pl.BlockSpec((br, tk), lambda i, j: (i, j)),         # x tile
                w_spec,                                              # weight
                w_spec,                                              # bias
            ],
            out_specs=pl.BlockSpec((br, tk), lambda i, j: (i, j)),
        ),
        compiler_params=pltpu.CompilerParams(
            dimension_semantics=("parallel", "parallel"),
            vmem_limit_bytes=vmem_limit),
    )(alpha, x2, w2, b2)


# ---------------- wrapper ----------------

def dynamic_tanh(x, alpha, weight, bias, channels_last, *, tile_bytes=None):
    x = jnp.asarray(x)
    orig_shape = x.shape
    dtype = x.dtype
    itemsize = jnp.dtype(dtype).itemsize
    sub_mult = max(8, 32 // max(1, itemsize))     # 8 for f32, 16 for bf16, 32 for int8/fp8

    kind = _device_kind()
    if tile_bytes is None:
        tile_bytes = _pick_tile_bytes(kind)
    compute_dtype = _pick_compute_dtype(dtype, kind)

    alpha = jnp.asarray(alpha, jnp.float32).reshape(1)
    w_flat = jnp.asarray(weight).reshape(-1)
    b_flat = jnp.asarray(bias).reshape(-1)
    C = int(w_flat.shape[0])

    launch = functools.partial(_launch_2d, alpha=alpha, tile_bytes=tile_bytes,
                               sub_mult=sub_mult, compute_dtype=compute_dtype)

    if channels_last:
        # weight/bias align with the trailing `weight.ndim` dims of x (normalized_shape).
        wnd = max(1, jnp.ndim(weight))
        trailing = 1
        for d in orig_shape[-wnd:]:
            trailing *= int(d)
        if trailing != C:
            raise ValueError(f"channels_last: trailing dims {orig_shape[-wnd:]} "
                             f"(prod={trailing}) do not match weight.size={C}")
        R = max(1, x.size // C)

        # Lane-densify small C: fold m rows into the lane dim; prefer K = m*C a multiple of 128
        # so every store is full-width (unmasked vst), else the largest divisor of R.
        m = 1
        if C < 1024:
            max_m = max(1, 1024 // C)
            best_any, best_128 = 1, 0
            for cand in range(1, max_m + 1):
                if R % cand == 0:
                    best_any = cand
                    if (cand * C) % 128 == 0:
                        best_128 = cand
            m = best_128 if best_128 > 0 else best_any
        K = m * C
        Rf = R // m

        x2 = x.reshape(Rf, K)                                    # contiguous -> free reshape
        w2 = jnp.tile(w_flat, m).reshape(1, K)                   # tiny host-side tile
        b2 = jnp.tile(b_flat, m).reshape(1, K)
        out2 = launch(x2, w2, b2, row_bcast_params=True)
        return out2.reshape(orig_shape)

    else:
        # PyTorch semantics: weight[:, None] broadcasts against x's last two dims (C, L).
        if x.ndim < 2:
            raise ValueError("channels_last=False requires x.ndim >= 2 (..., C, L)")
        if int(orig_shape[-2]) != C:
            raise ValueError(f"channels_last=False: x.shape[-2]={orig_shape[-2]} "
                             f"does not match weight.size={C}")
        L = int(orig_shape[-1])
        B = 1
        for d in orig_shape[:-2]:
            B *= int(d)
        R = B * C

        if L >= 128:
            # 2-D (B*C, L) view: no sublane padding for small / odd C, long contiguous DMAs,
            # and large C is just more rows (no oversized (1, C, tl) block on v7x).
            x2 = x.reshape(R, L)
            w2 = jnp.tile(w_flat, B).reshape(R, 1)               # ~1/L of x traffic: negligible
            b2 = jnp.tile(b_flat, B).reshape(R, 1)
            out2 = launch(x2, w2, b2, row_bcast_params=False)
        else:
            # Tiny L: fold t whole channel cycles (m = t*C rows) into the lane dim so the params
            # become a (1, K) row broadcast and stores are lane-dense (prefer K % 128 == 0).
            base = C * L
            max_t = max(1, min(B, max(1, 8192 // max(1, base))))
            best_any, best_128 = 1, 0
            for t in range(1, max_t + 1):
                if B % t == 0:
                    best_any = t
                    if (t * base) % 128 == 0:
                        best_128 = t
            t = best_128 if best_128 > 0 else best_any
            m = C * t
            K = m * L
            Rf = R // m
            x2 = x.reshape(Rf, K)
            w2 = jnp.tile(jnp.repeat(w_flat, L), t).reshape(1, K)
            b2 = jnp.tile(jnp.repeat(b_flat, L), t).reshape(1, K)
            out2 = launch(x2, w2, b2, row_bcast_params=True)
        return out2.reshape(orig_shape)


# ---------------- reference & test ----------------

def _reference(x, alpha, weight, bias, channels_last):
    y = jnp.tanh(alpha[0] * x)
    if channels_last:
        return y * weight + bias
    return y * weight[:, None] + bias[:, None]


if __name__ == "__main__":
    key = jax.random.PRNGKey(0)
    alpha = jnp.array([0.5], dtype=jnp.float32)

    # ---- case 1: channels_last=False, (B, C, T) conv-style input, tiny T (fold path) ----
    B, C, T = 2, 4, 16
    k1, k2, k3, key = jax.random.split(key, 4)
    x_cf = jax.random.normal(k1, (B, C, T), dtype=jnp.float32)
    w_c = 1.0 + 0.1 * jax.random.normal(k2, (C,), dtype=jnp.float32)
    b_c = 0.1 * jax.random.normal(k3, (C,), dtype=jnp.float32)

    out1 = dynamic_tanh(x_cf, alpha, w_c, b_c, channels_last=False)
    jax.block_until_ready(out1)
    ref1 = _reference(x_cf, alpha, w_c, b_c, channels_last=False)
    assert jnp.allclose(out1, ref1, atol=1e-5, rtol=1e-5)

    # ---- case 1b: channels_last=False, longer spatial dim (lane-broadcast 2-D path) ----
    k4, key = jax.random.split(key)
    x_cf2 = jax.random.normal(k4, (B, C, 256), dtype=jnp.float32)
    out1b = dynamic_tanh(x_cf2, alpha, w_c, b_c, channels_last=False)
    jax.block_until_ready(out1b)
    ref1b = _reference(x_cf2, alpha, w_c, b_c, channels_last=False)
    assert jnp.allclose(out1b, ref1b, atol=1e-5, rtol=1e-5)

    # ---- case 2: channels_last=True, (B, L, D) input, normalized_shape = D ----
    Bt, Ls, D = 2, 8, 32
    k5, k6, k7, key = jax.random.split(key, 4)
    x_cl = jax.random.normal(k5, (Bt, Ls, D), dtype=jnp.float32)
    w_d = 1.0 + 0.1 * jax.random.normal(k6, (D,), dtype=jnp.float32)
    b_d = 0.1 * jax.random.normal(k7, (D,), dtype=jnp.float32)

    out2 = dynamic_tanh(x_cl, alpha, w_d, b_d, channels_last=True)
    jax.block_until_ready(out2)
    ref2 = _reference(x_cl, alpha, w_d, b_d, channels_last=True)
    assert jnp.allclose(out2, ref2, atol=1e-5, rtol=1e-5)

    # ---- case 3: bf16 input (native bf16 compute on v6e/v7x, f32 on older chips) ----
    x_bf = x_cl.astype(jnp.bfloat16)
    out3 = dynamic_tanh(x_bf, alpha, w_d, b_d, channels_last=True)
    jax.block_until_ready(out3)
    ref3 = _reference(x_bf.astype(jnp.float32), alpha, w_d, b_d, channels_last=True)
    assert jnp.allclose(out3.astype(jnp.float32), ref3, atol=5e-2, rtol=5e-2)

    print("KERNEL_OK")
</pallas_src>

<mosaic_0001>
module attributes {stable_mosaic.version = 11 : i64} {
  func.func @_dytanh_kernel(%arg0: i32, %arg1: i32, %arg2: memref<1xf32, #tpu.memory_space<smem>>, %arg3: memref<1x128xf32, #tpu.memory_space<vmem>>, %arg4: memref<1x128xf32, #tpu.memory_space<vmem>>, %arg5: memref<1x128xf32, #tpu.memory_space<vmem>>, %arg6: memref<1x128xf32, #tpu.memory_space<vmem>>) attributes {dimension_semantics = [#tpu.dimension_semantics<parallel>, #tpu.dimension_semantics<parallel>], iteration_bounds = array<i64: 1, 1>, scalar_prefetch = 0 : i64, scratch_operands = 0 : i64, tpu.core_type = #tpu.core_type<tc>, window_params = [{transform_indices = @transform_0, window_bounds = array<i64: 1>}, {transform_indices = @transform_1, window_bounds = array<i64: 1, 128>}, {transform_indices = @transform_2, window_bounds = array<i64: 1, 128>}, {transform_indices = @transform_3, window_bounds = array<i64: 1, 128>}, {transform_indices = @transform_4, window_bounds = array<i64: 1, 128>}]} {
    %c0 = arith.constant 0 : index
    %0 = memref.load %arg2[%c0] : memref<1xf32, #tpu.memory_space<smem>>
    %c0_0 = arith.constant 0 : index
    %c0_1 = arith.constant 0 : index
    %1 = vector.load %arg3[%c0_0, %c0_1] : memref<1x128xf32, #tpu.memory_space<vmem>>, vector<1x128xf32>
    %c0_2 = arith.constant 0 : index
    %c0_3 = arith.constant 0 : index
    %2 = vector.load %arg4[%c0_2, %c0_3] : memref<1x128xf32, #tpu.memory_space<vmem>>, vector<1x128xf32>
    %c0_4 = arith.constant 0 : index
    %c0_5 = arith.constant 0 : index
    %3 = vector.load %arg5[%c0_4, %c0_5] : memref<1x128xf32, #tpu.memory_space<vmem>>, vector<1x128xf32>
    %4 = vector.broadcast %0 : f32 to vector<1x128xf32>
    %5 = arith.mulf %4, %1 : vector<1x128xf32>
    %6 = math.tanh %5 : vector<1x128xf32>
    %7 = arith.mulf %6, %2 : vector<1x128xf32>
    %8 = arith.addf %7, %3 : vector<1x128xf32>
    %c0_6 = arith.constant 0 : index
    %c0_7 = arith.constant 0 : index
    %9 = vector.load %arg6[%c0_6, %c0_7] : memref<1x128xf32, #tpu.memory_space<vmem>>, vector<1x128xf32>
    tpu.vector_store %arg6[%c0_6, %c0_7], %8 {strides = array<i32>} : memref<1x128xf32, #tpu.memory_space<vmem>>, vector<1x128xf32>,
    return
  }
  func.func @transform_0(%arg0: i32, %arg1: i32) -> i32 {
    %c0_i32 = arith.constant 0 : i32
    %c0_i32_0 = arith.constant 0 : i32
    return %c0_i32 : i32
  }
  func.func @transform_1(%arg0: i32, %arg1: i32) -> (i32, i32) {
    %c0_i32 = arith.constant 0 : i32
    return %arg0, %arg1 : i32, i32
  }
  func.func @transform_2(%arg0: i32, %arg1: i32) -> (i32, i32) {
    %c0_i32 = arith.constant 0 : i32
    %c0_i32_0 = arith.constant 0 : i32
    return %c0_i32, %arg1 : i32, i32
  }
  func.func @transform_3(%arg0: i32, %arg1: i32) -> (i32, i32) {
    %c0_i32 = arith.constant 0 : i32
    %c0_i32_0 = arith.constant 0 : i32
    return %c0_i32, %arg1 : i32, i32
  }
  func.func @transform_4(%arg0: i32, %arg1: i32) -> (i32, i32) {
    %c0_i32 = arith.constant 0 : i32
    return %arg0, %arg1 : i32, i32
  }
}

</mosaic_0001>

<bundles_post_ra>
// kernel: tpu_custom_call.1
= control target key start
LH: loop header
LB: loop body
LE: loop exit
PB: predicated region body
PF: predicated region fallthrough
CT: control target
= control target key end

     0   :  { %s120_s0 = inlined_call_operand.<no memory space> [shape: f32[1], index: 0, kind: input, shape index: {}]   ;;  %s121_s1 = inlined_call_operand.vmem [shape: f32[1,128], index: 1, kind: input, shape index: {}]   ;;  %s122_s2 = inlined_call_operand.vmem [shape: f32[1,128], index: 2, kind: input, shape index: {}]   ;;  %s123_s3 = inlined_call_operand.vmem [shape: f32[1,128], index: 3, kind: input, shape index: {}]   ;;  %s124_s4 = inlined_call_operand.hbm [shape: f32[1,128], index: 4, kind: output, shape index: {}]  }
   0x1   :  { %v20_v0 = vld [vmem:[%s121_s1] sm:$0x1]  ;;  %v23_v1 = vstv %s120_s0 }
   0x2   :  { %v24_v2 = vmul.f32 %v23_v1, %v20_v0 }
   0x3   :  { %10 = vsyncpa [#allocation4], 0  ;;  %v21_v3 = vld [vmem:[%s122_s2] sm:$0x1]  ;;  %s70_s23 = smov [#allocation3]  }
   0x4   :  { %44 = vtanh.f32 %v24_v2  ;;  %v22_v5 = vld [vmem:[%s123_s3] sm:$0x1]  ;;  %s35_s24 = sshll.u32 %s70_s23, 4  ;;  %s36_s24 = int_to_ptr.vmem [resolvable:$true] %s35_s24 }
   0x5   :  { %s46_s1 = scalar_lea.vmem %s36_s24, 16  ;;  %s50_s0 = scalar_lea.vmem %s36_s24, 32 }
   0x6   :  { %p47_p0 = scmp.ne.s32.totalorder %s36_s24, %s46_s1  ;;  %p51_p1 = scmp.lt.s32.totalorder %s36_s24, %s36_s24 }
   0x7   :  { %p52_p2 = scmp.lt.s32.totalorder %s50_s0, %s46_s1 }
   0x9   :  { %p53_p3 = por %p52_p2, %p51_p1 }
   0xb   :  { %p54_p4 = pnand %p53_p3, %p47_p0 }
   0xe   :  { %v45_v4 = vpop.eup %44 }
   0xf   :  { %v26_v6 = vmul.f32 %v45_v4, %v21_v3 }
  0x11   :  { %v27_v7 = vadd.f32 %v26_v6, %v22_v5 }
  0x13   :  { %28 = vst [vmem:[#allocation3] sm:$0x1] %v27_v7 }
  0x14   :  { %57 = shalt.err (!%p54_p4)
}
  0x15   :  { %s58_s26 = scalar_lea.hbm %s124_s4, 16 }
  0x16   :  { %p59_p5 = scmp.ne.s32.totalorder %s124_s4, %s58_s26  ;;  %p62_p6 = scmp.lt.u32.totalorder %s58_s26, %s124_s4 }
  0x18   :  { %p64_p7 = pnand %p62_p6, %p59_p5 }
  0x1a   :  { %67 = shalt.err (!%p64_p7)
}
  0x1b   :  { %38 = dma.vmem_to_hbm [thread:$0]  %s36_s24, 16, %s124_s4, [#allocation4]  }
  0x1c   :  { %68 = dma.done.wait [#allocation4], 16  }
  0x1d   :  { %69 = vsyncadd [#allocation4], 4294967280 }
  0x1e   :  { %42 = vsyncpa [#allocation4], 1 }

</bundles_post_ra>
